<compile_context>
chip_gen: v6e
topology: v6e:2x2x1
jax: 0.10.0
libtpu: 0.0.40
codegen_flags: <defaults>
</compile_context>

<pallas_src>
import functools
import math

import jax
import jax.numpy as jnp
from jax.experimental import pallas as pl
from jax.experimental.pallas import tpu as pltpu


_INV_SQRT2 = 0.7071067811865476


def _erf_f32(x):
    """float32 erf via Abramowitz & Stegun 7.1.26 (max abs error ~1.5e-7)."""
    a1, a2, a3, a4, a5 = (0.254829592, -0.284496736, 1.421413741,
                          -1.453152027, 1.061405429)
    p = 0.3275911
    ax = jnp.abs(x)
    t = 1.0 / (1.0 + p * ax)
    poly = ((((a5 * t + a4) * t + a3) * t + a2) * t + a1) * t
    y = 1.0 - poly * jnp.exp(-(ax * ax))
    return jnp.where(x < 0.0, -y, y)


def _gelu_f32(x, approximate):
    if approximate:
        # tanh form (torch.nn.GELU(approximate='tanh')): cheaper, tanh -> EUP.
        c = math.sqrt(2.0 / math.pi)
        return 0.5 * x * (1.0 + jnp.tanh(c * (x + 0.044715 * x * x * x)))
    # exact (erf) form -- matches torch.nn.GELU() default numerics to ~1.5e-7.
    return 0.5 * x * (1.0 + _erf_f32(x * _INV_SQRT2))


def _abc_kernel(x_ref, wt_ref, b_ref, o_ref, acc_ref, *, inv_hw, num_groups,
                approximate_gelu):
    # x_ref  : (TILE_N, C, HW_TILE)   activation tile (native dtype)
    # wt_ref : (C, C_out) f32         1x1-conv weight, transposed (VMEM-resident)
    # b_ref  : (1, C_out) f32         conv bias (VMEM-resident)
    # o_ref  : (TILE_N, C_out)        pooled + projected output for this batch tile
    # acc_ref: (TILE_N, C, 128) f32   lane-parallel running spatial sum
    k = pl.program_id(1)

    @pl.when(k == 0)
    def _():
        acc_ref[...] = jnp.zeros_like(acc_ref)

    # Cast to f32 in-register after the DMA; HBM/VMEM traffic stays native.
    xg = _gelu_f32(x_ref[...].astype(jnp.float32), approximate_gelu)

    # Lane-parallel partial sums: fold HW_TILE onto 128 lanes with static,
    # lane-aligned slices (pure VALU adds).  The single cross-lane reduction
    # is deferred to the finalize step below.
    partial = xg[:, :, 0:128]
    for g in range(1, num_groups):
        partial = partial + xg[:, :, g * 128:(g + 1) * 128]
    acc_ref[...] += partial

    @pl.when(k == pl.num_programs(1) - 1)
    def _():
        # One XLU lane-reduce per batch tile, then the 1x1 conv on the MXU.
        pooled = jnp.sum(acc_ref[...], axis=-1) * inv_hw            # (TILE_N, C)
        out = jnp.dot(pooled, wt_ref[...],
                      preferred_element_type=jnp.float32) + b_ref[...]
        o_ref[...] = out.astype(o_ref.dtype)


def _round_up(x, m):
    return (x + m - 1) // m * m


def _vmem_capacity_bytes():
    """Physical VMEM of the current part (64 MiB v7x per-TC, 128 MiB v5e/v6e)."""
    try:
        cap = int(pltpu.get_tpu_info().vmem_capacity_bytes)
        if cap > 0:
            return max(cap, 32 * 1024 * 1024)
    except Exception:
        pass
    return 64 * 1024 * 1024  # conservative default


def _pick_batch_tile(n, c_pad, itemsize, block_budget_bytes, limit=64):
    """Divisor of n for the batch tile.

    The batch tile is the second-to-last dim of the output block, so it must
    be a multiple of 8 or the full batch.  Keep the minimal (hw_tile=128) x
    block inside the VMEM budget and prefer >= 2 steps on the batch
    ('parallel') axis so both v7x TensorCores get work."""
    min_block = c_pad * 128 * itemsize
    cands = [t for t in range(1, min(n, limit) + 1)
             if n % t == 0 and (t % 8 == 0 or t == n)
             and t * min_block <= block_budget_bytes]
    if not cands:
        cands = [t for t in range(1, n + 1)
                 if n % t == 0 and (t % 8 == 0 or t == n)]
    multi = [t for t in cands if n // t >= 2]
    return max(multi) if multi else max(cands)


def _pick_hw_tile(hw_pad, rows, itemsize, block_budget_bytes, max_groups=64):
    """Largest multiple-of-128 divisor of hw_pad fitting the byte budget
    (and keeping the unrolled lane-group accumulation short)."""
    by_budget = (block_budget_bytes // max(1, rows * itemsize)) // 128 * 128
    limit = max(128, min(hw_pad, max_groups * 128, by_budget))
    best, t = 128, 128
    while t <= limit:
        if hw_pad % t == 0:
            best = t
        t += 128
    return best


def activation_bias_correction_net(x_nchw, conv_w, conv_b, *,
                                   approximate_gelu=False):
    """Fused GELU -> AdaptiveAvgPool2d(1) -> Conv2d(C, C_out, 1) forward.

    x_nchw: (N, C, H, W); conv_w: (C_out, C, 1, 1); conv_b: (C_out,).
    Returns (N, C_out, 1, 1) in x's dtype."""
    N, C, H, W = x_nchw.shape
    C_out = conv_w.shape[0]
    HW = H * W
    out_dtype = x_nchw.dtype
    itemsize = x_nchw.dtype.itemsize

    # Activation stays in its native dtype for the HBM->VMEM stream.
    x = x_nchw.reshape(N, C, HW)

    # Pad the spatial axis to a multiple of 128 so every spatial tile is
    # lane-aligned.  GELU(0) == 0, so zero padding contributes nothing to the
    # sums while we still divide by the true HW.
    HW_pad = _round_up(HW, 128)
    if HW_pad != HW:
        x = jnp.pad(x, ((0, 0), (0, 0), (0, HW_pad - HW)))

    wt = conv_w.reshape(C_out, C).T.astype(jnp.float32)          # (C, C_out)
    b = conv_b.reshape(1, C_out).astype(jnp.float32)

    # ---- generation-aware tile / VMEM budgeting ---------------------------
    vmem_cap = _vmem_capacity_bytes()
    block_budget = max(1 << 20, min(16 << 20, vmem_cap // 12))

    c_pad = _round_up(C, 8)                     # VMEM sublane padding of the C axis
    tile_n = _pick_batch_tile(N, c_pad, itemsize, block_budget)
    hw_tile = _pick_hw_tile(HW_pad, tile_n * c_pad, itemsize, block_budget)
    num_groups = hw_tile // 128

    x_block_bytes = tile_n * c_pad * hw_tile * itemsize
    est_bytes = (2 * x_block_bytes                               # double-buffered x
                 + tile_n * c_pad * hw_tile * 4                  # f32 GELU temporary
                 + tile_n * c_pad * 128 * 4                      # lane-parallel acc
                 + 2 * (C * C_out + C_out + tile_n * C_out) * 4  # wt / b / out
                 + (4 << 20))                                    # compiler headroom
    vmem_limit = int(min(max(est_bytes, 32 << 20), (vmem_cap * 3) // 4))

    cost = pl.CostEstimate(
        flops=int(N * C * HW_pad * 16 + 2 * N * C * C_out),
        transcendentals=int(N * C * HW_pad),
        bytes_accessed=int(N * C * HW_pad * itemsize
                           + (C * C_out + C_out) * 4
                           + N * C_out * itemsize),
    )

    kernel = functools.partial(_abc_kernel,
                               inv_hw=1.0 / float(HW),
                               num_groups=num_groups,
                               approximate_gelu=approximate_gelu)

    out = pl.pallas_call(
        kernel,
        out_shape=jax.ShapeDtypeStruct((N, C_out), out_dtype),
        grid_spec=pltpu.PrefetchScalarGridSpec(
            num_scalar_prefetch=0,
            grid=(N // tile_n, HW_pad // hw_tile),
            in_specs=[
                # C is a full-extent block dim (always legal); hw_tile is a
                # multiple of 128.  Weight/bias blocks are constant across the
                # grid -> stay resident in VMEM.
                pl.BlockSpec((tile_n, C, hw_tile), lambda n, k: (n, 0, k)),
                pl.BlockSpec((C, C_out), lambda n, k: (0, 0)),
                pl.BlockSpec((1, C_out), lambda n, k: (0, 0)),
            ],
            out_specs=pl.BlockSpec((tile_n, C_out), lambda n, k: (n, 0)),
            scratch_shapes=[pltpu.VMEM((tile_n, C, 128), jnp.float32)],
        ),
        compiler_params=pltpu.CompilerParams(
            dimension_semantics=("parallel", "arbitrary"),
            vmem_limit_bytes=vmem_limit,
        ),
        cost_estimate=cost,
    )(x, wt, b)

    # Conv2d applied to the 1x1 pooled feature map -> NCHW (N, C_out, 1, 1)
    return out.reshape(N, C_out, 1, 1)


def _reference(x_nchw, conv_w, conv_b):
    xg = jax.nn.gelu(x_nchw.astype(jnp.float32), approximate=False)
    pooled = jnp.mean(xg, axis=(2, 3))                           # (N, C)
    w2d = conv_w.reshape(conv_w.shape[0], -1).astype(jnp.float32)
    out = pooled @ w2d.T + conv_b.astype(jnp.float32)[None, :]   # (N, C_out)
    return out[:, :, None, None]


if __name__ == "__main__":
    N, C, H, W, C_out = 2, 4, 16, 16, 8

    key = jax.random.PRNGKey(0)
    kx, kw, kb = jax.random.split(key, 3)
    x = jax.random.normal(kx, (N, C, H, W), dtype=jnp.float32)
    conv_w = jax.random.normal(kw, (C_out, C, 1, 1), dtype=jnp.float32) * 0.1
    conv_b = jax.random.normal(kb, (C_out,), dtype=jnp.float32) * 0.1

    y = activation_bias_correction_net(x, conv_w, conv_b)
    y = jax.block_until_ready(y)

    y_ref = _reference(x, conv_w, conv_b)
    assert y.shape == (N, C_out, 1, 1)
    assert jnp.allclose(y, y_ref, atol=2e-5, rtol=2e-5), (
        float(jnp.max(jnp.abs(y.astype(jnp.float32) - y_ref))))

    print("KERNEL_OK")
</pallas_src>

<mosaic_0001>
module attributes {stable_mosaic.version = 11 : i64} {
  func.func @_abc_kernel(%arg0: i32, %arg1: i32, %arg2: memref<2x4x256xf32, #tpu.memory_space<vmem>>, %arg3: memref<4x8xf32, #tpu.memory_space<vmem>>, %arg4: memref<1x8xf32, #tpu.memory_space<vmem>>, %arg5: memref<2x8xf32, #tpu.memory_space<vmem>>, %arg6: memref<2x4x128xf32, #tpu.memory_space<vmem>>) attributes {dimension_semantics = [#tpu.dimension_semantics<parallel>, #tpu.dimension_semantics<arbitrary>], iteration_bounds = array<i64: 1, 1>, scalar_prefetch = 0 : i64, scratch_operands = 1 : i64, tpu.core_type = #tpu.core_type<tc>, window_params = [{transform_indices = @transform_0, window_bounds = array<i64: 2, 4, 256>}, {pipeline_mode = #tpu.pipeline_mode<synchronous>, transform_indices = @transform_1, window_bounds = array<i64: 4, 8>}, {pipeline_mode = #tpu.pipeline_mode<synchronous>, transform_indices = @transform_2, window_bounds = array<i64: 1, 8>}, {transform_indices = @transform_3, window_bounds = array<i64: 2, 8>}]} {
    %c0_i32 = arith.constant 0 : i32
    %0 = arith.cmpi eq, %arg1, %c0_i32 : i32
    %1 = arith.extui %0 : i1 to i32
    %c0_i32_0 = arith.constant 0 : i32
    %2 = arith.cmpi ne, %1, %c0_i32_0 : i32
    scf.if %2 {
      %cst_25 = arith.constant 0.000000e+00 : f32
      %53 = vector.broadcast %cst_25 : f32 to vector<2x4x128xf32>
      %c0_26 = arith.constant 0 : index
      %c0_27 = arith.constant 0 : index
      %c0_28 = arith.constant 0 : index
      %54 = vector.load %arg6[%c0_26, %c0_27, %c0_28] : memref<2x4x128xf32, #tpu.memory_space<vmem>>, vector<2x4x128xf32>
      tpu.vector_store %arg6[%c0_26, %c0_27, %c0_28], %53 {strides = array<i32>} : memref<2x4x128xf32, #tpu.memory_space<vmem>>, vector<2x4x128xf32>,
    } else {
    }
    %c0 = arith.constant 0 : index
    %c0_1 = arith.constant 0 : index
    %c0_2 = arith.constant 0 : index
    %3 = vector.load %arg2[%c0, %c0_1, %c0_2] : memref<2x4x256xf32, #tpu.memory_space<vmem>>, vector<2x4x256xf32>
    %cst = arith.constant 5.000000e-01 : f32
    %4 = vector.broadcast %cst : f32 to vector<2x4x256xf32>
    %5 = arith.mulf %4, %3 : vector<2x4x256xf32>
    %cst_3 = arith.constant 0.707106769 : f32
    %6 = vector.broadcast %cst_3 : f32 to vector<2x4x256xf32>
    %7 = arith.mulf %3, %6 : vector<2x4x256xf32>
    %8 = math.absf %7 : vector<2x4x256xf32>
    %cst_4 = arith.constant 0.327591091 : f32
    %9 = vector.broadcast %cst_4 : f32 to vector<2x4x256xf32>
    %10 = arith.mulf %9, %8 : vector<2x4x256xf32>
    %cst_5 = arith.constant 1.000000e+00 : f32
    %11 = vector.broadcast %cst_5 : f32 to vector<2x4x256xf32>
    %12 = arith.addf %11, %10 : vector<2x4x256xf32>
    %cst_6 = arith.constant 1.000000e+00 : f32
    %13 = vector.broadcast %cst_6 : f32 to vector<2x4x256xf32>
    %14 = arith.divf %13, %12 : vector<2x4x256xf32>
    %cst_7 = arith.constant 1.06140542 : f32
    %15 = vector.broadcast %cst_7 : f32 to vector<2x4x256xf32>
    %16 = arith.mulf %15, %14 : vector<2x4x256xf32>
    %cst_8 = arith.constant -1.45315206 : f32
    %17 = vector.broadcast %cst_8 : f32 to vector<2x4x256xf32>
    %18 = arith.addf %16, %17 : vector<2x4x256xf32>
    %19 = arith.mulf %18, %14 : vector<2x4x256xf32>
    %cst_9 = arith.constant 1.42141378 : f32
    %20 = vector.broadcast %cst_9 : f32 to vector<2x4x256xf32>
    %21 = arith.addf %19, %20 : vector<2x4x256xf32>
    %22 = arith.mulf %21, %14 : vector<2x4x256xf32>
    %cst_10 = arith.constant -0.284496725 : f32
    %23 = vector.broadcast %cst_10 : f32 to vector<2x4x256xf32>
    %24 = arith.addf %22, %23 : vector<2x4x256xf32>
    %25 = arith.mulf %24, %14 : vector<2x4x256xf32>
    %cst_11 = arith.constant 0.254829586 : f32
    %26 = vector.broadcast %cst_11 : f32 to vector<2x4x256xf32>
    %27 = arith.addf %25, %26 : vector<2x4x256xf32>
    %28 = arith.mulf %27, %14 : vector<2x4x256xf32>
    %29 = arith.mulf %8, %8 : vector<2x4x256xf32>
    %cst_12 = arith.constant 0.000000e+00 : f32
    %30 = vector.broadcast %cst_12 : f32 to vector<2x4x256xf32>
    %31 = arith.subf %30, %29 : vector<2x4x256xf32>
    %32 = math.exp %31 : vector<2x4x256xf32>
    %33 = arith.mulf %28, %32 : vector<2x4x256xf32>
    %cst_13 = arith.constant 1.000000e+00 : f32
    %34 = vector.broadcast %cst_13 : f32 to vector<2x4x256xf32>
    %35 = arith.subf %34, %33 : vector<2x4x256xf32>
    %cst_14 = arith.constant 0.000000e+00 : f32
    %36 = vector.broadcast %cst_14 : f32 to vector<2x4x256xf32>
    %37 = arith.cmpf olt, %7, %36 : vector<2x4x256xf32>
    %cst_15 = arith.constant 0.000000e+00 : f32
    %38 = vector.broadcast %cst_15 : f32 to vector<2x4x256xf32>
    %39 = arith.subf %38, %35 : vector<2x4x256xf32>
    %40 = arith.select %37, %39, %35 : vector<2x4x256xi1>, vector<2x4x256xf32>
    %cst_16 = arith.constant 1.000000e+00 : f32
    %41 = vector.broadcast %cst_16 : f32 to vector<2x4x256xf32>
    %42 = arith.addf %41, %40 : vector<2x4x256xf32>
    %43 = arith.mulf %5, %42 : vector<2x4x256xf32>
    %44 = vector.extract_strided_slice %43 {offsets = [0, 0, 0], sizes = [2, 4, 128], strides = [1, 1, 1]} : vector<2x4x256xf32> to vector<2x4x128xf32>
    %45 = vector.extract_strided_slice %43 {offsets = [0, 0, 128], sizes = [2, 4, 128], strides = [1, 1, 1]} : vector<2x4x256xf32> to vector<2x4x128xf32>
    %46 = arith.addf %44, %45 : vector<2x4x128xf32>
    %c0_17 = arith.constant 0 : index
    %c0_18 = arith.constant 0 : index
    %c0_19 = arith.constant 0 : index
    %47 = vector.load %arg6[%c0_17, %c0_18, %c0_19] : memref<2x4x128xf32, #tpu.memory_space<vmem>>, vector<2x4x128xf32>
    %48 = arith.addf %47, %46 : vector<2x4x128xf32>
    %c0_20 = arith.constant 0 : index
    %c0_21 = arith.constant 0 : index
    %c0_22 = arith.constant 0 : index
    %49 = vector.load %arg6[%c0_20, %c0_21, %c0_22] : memref<2x4x128xf32, #tpu.memory_space<vmem>>, vector<2x4x128xf32>
    tpu.vector_store %arg6[%c0_20, %c0_21, %c0_22], %48 {strides = array<i32>} : memref<2x4x128xf32, #tpu.memory_space<vmem>>, vector<2x4x128xf32>,
    %c0_i32_23 = arith.constant 0 : i32
    %50 = arith.cmpi eq, %arg1, %c0_i32_23 : i32
    %51 = arith.extui %50 : i1 to i32
    %c0_i32_24 = arith.constant 0 : i32
    %52 = arith.cmpi ne, %51, %c0_i32_24 : i32
    scf.if %52 {
      %c0_25 = arith.constant 0 : index
      %c0_26 = arith.constant 0 : index
      %c0_27 = arith.constant 0 : index
      %53 = vector.load %arg6[%c0_25, %c0_26, %c0_27] : memref<2x4x128xf32, #tpu.memory_space<vmem>>, vector<2x4x128xf32>
      %cst_28 = arith.constant dense<0.000000e+00> : vector<2x4xf32>
      %54 = vector.multi_reduction <add>, %53, %cst_28 [2] : vector<2x4x128xf32> to vector<2x4xf32>
      %cst_29 = arith.constant 3.906250e-03 : f32
      %55 = vector.broadcast %cst_29 : f32 to vector<2x4xf32>
      %56 = arith.mulf %54, %55 : vector<2x4xf32>
      %c0_30 = arith.constant 0 : index
      %c0_31 = arith.constant 0 : index
      %57 = vector.load %arg3[%c0_30, %c0_31] : memref<4x8xf32, #tpu.memory_space<vmem>>, vector<4x8xf32>
      %cst_32 = arith.constant dense<0.000000e+00> : vector<2x8xf32>
      %58 = tpu.matmul %56, %57, %cst_32 {dimension_numbers = #tpu.dot_dimension_numbers<[1], [0], [0], [1], [0, 0, 1, 1], [], []>} : vector<2x4xf32>, vector<4x8xf32>, vector<2x8xf32> -> vector<2x8xf32>
      %c0_33 = arith.constant 0 : index
      %c0_34 = arith.constant 0 : index
      %59 = vector.load %arg4[%c0_33, %c0_34] : memref<1x8xf32, #tpu.memory_space<vmem>>, vector<1x8xf32>
      %60 = vector.broadcast %59 : vector<1x8xf32> to vector<2x8xf32>
      %61 = arith.addf %58, %60 : vector<2x8xf32>
      %c0_35 = arith.constant 0 : index
      %c0_36 = arith.constant 0 : index
      %62 = vector.load %arg5[%c0_35, %c0_36] : memref<2x8xf32, #tpu.memory_space<vmem>>, vector<2x8xf32>
      tpu.vector_store %arg5[%c0_35, %c0_36], %61 {strides = array<i32>} : memref<2x8xf32, #tpu.memory_space<vmem>>, vector<2x8xf32>,
    } else {
    }
    return
  }
  func.func @transform_0(%arg0: i32, %arg1: i32) -> (i32, i32, i32) {
    %c0_i32 = arith.constant 0 : i32
    %c0_i32_0 = arith.constant 0 : i32
    return %arg0, %c0_i32, %arg1 : i32, i32, i32
  }
  func.func @transform_1(%arg0: i32, %arg1: i32) -> (i32, i32) {
    %c0_i32 = arith.constant 0 : i32
    %c0_i32_0 = arith.constant 0 : i32
    %c0_i32_1 = arith.constant 0 : i32
    return %c0_i32, %c0_i32_0 : i32, i32
  }
  func.func @transform_2(%arg0: i32, %arg1: i32) -> (i32, i32) {
    %c0_i32 = arith.constant 0 : i32
    %c0_i32_0 = arith.constant 0 : i32
    %c0_i32_1 = arith.constant 0 : i32
    return %c0_i32, %c0_i32_0 : i32, i32
  }
  func.func @transform_3(%arg0: i32, %arg1: i32) -> (i32, i32) {
    %c0_i32 = arith.constant 0 : i32
    %c0_i32_0 = arith.constant 0 : i32
    return %arg0, %c0_i32 : i32, i32
  }
}

</mosaic_0001>

<bundles_post_ra>
// kernel: tpu_custom_call.1
= control target key start
LH: loop header
LB: loop body
LE: loop exit
PB: predicated region body
PF: predicated region fallthrough
CT: control target
= control target key end

     0   :  { %8 = vsyncpa [#allocation4], 0  ;;  %s381_s0 = inlined_call_operand.hbm [shape: f32[2,4,256], index: 0, kind: input, shape index: {}]   ;;  %s382_s1 = inlined_call_operand.hbm [shape: f32[4,8], index: 1, kind: input, shape index: {}]   ;;  %s383_s2 = inlined_call_operand.vmem [shape: f32[1,8], index: 2, kind: input, shape index: {}]   ;;  %s384_s3 = inlined_call_operand.hbm [shape: f32[2,8], index: 3, kind: output, shape index: {}]  }
   0x1   :  { %9 = vsyncpa [#allocation7], 0 }
   0x2   :  { %10 = vsyncpa [#allocation5], 0  ;;  %s338_s12 = smov [#allocation3]  }
   0x3   :  { %s16_s13 = sshll.u32 %s338_s12, 4  ;;  %s17_s13 = int_to_ptr.vmem [resolvable:$true] %s16_s13 }
   0x4   :  { %s280_s14 = scalar_lea.vmem %s17_s13, 256  ;;  %p285_p1 = scmp.lt.s32.totalorder %s17_s13, %s17_s13 }
   0x5   :  { %p281_p0 = scmp.ne.s32.totalorder %s17_s13, %s280_s14  ;;  %p286_p2 = scmp.lt.s32.totalorder %s280_s14, %s280_s14 }
   0x7   :  { %p287_p3 = por %p286_p2, %p285_p1 }
   0x9   :  { %p288_p4 = pnand %p287_p3, %p281_p0 }
   0xb   :  { %291 = shalt.err (!%p288_p4)
}
   0xc   :  { %s339_s15 = smov 128   ;;  %s340_s16 = smov 8  }
   0xd   :  { %22 = dma.hbm_to_vmem [thread:$0]  %s381_s0, 256, %s17_s13, [#allocation4], %s339_s15, %s339_s15, %s340_s16  }
   0xe   :  { %s341_s19 = smov [#allocation6]  }
   0xf   :  { %s29_s20 = sshll.u32 %s341_s19, 4  ;;  %s30_s20 = int_to_ptr.vmem [resolvable:$true] %s29_s20 }
  0x10   :  { %s300_s21 = scalar_lea.vmem %s30_s20, 64  ;;  %p305_p6 = scmp.lt.s32.totalorder %s30_s20, %s30_s20 }
  0x11   :  { %p301_p5 = scmp.ne.s32.totalorder %s30_s20, %s300_s21  ;;  %p306_p7 = scmp.lt.s32.totalorder %s300_s21, %s300_s21 }
  0x13   :  { %p307_p8 = por %p306_p7, %p305_p6 }
  0x15   :  { %p308_p9 = pnand %p307_p8, %p301_p5 }
  0x17   :  { %311 = shalt.err (!%p308_p9)
}
  0x18   :  { %32 = dma.hbm_to_vmem [thread:$0]  %s382_s1, 64, %s30_s20, [#allocation7]  }
  0x19   :  { %332 = dma.done.wait [#allocation4], 256  }
  0x1a   :  { %333 = vsyncadd [#allocation4], 4294967040 }
  0x1b   :  { %334 = dma.done.wait [#allocation7], 64  }
  0x1c   :  { %335 = vsyncadd [#allocation7], 4294967232  ;;  %v342_v0 = vmov 0.0   ;;  %v47_v1 = vld [vmem:[#allocation3] sm:$0xff]  ;;  %v48_v2 = vld [vmem:[#allocation3 + $0x8] sm:$0xff]  ;;  %vm122_vm2 = vcmask 1043456  }
  0x1d   :  { %45 = vst [vmem:[#allocation2] sm:$0xf] %v342_v0  ;;  %46 = vst [vmem:[#allocation2 + $0x4] sm:$0xf] %v342_v0  ;;  %252 = vmatprep.subr.mxu0 %v342_v0  ;;  %v51_v3 = vmul.f32 0.70710677, %v47_v1 }
  0x1e   :  { %v52_v4 = vmul.f32 0.70710677, %v48_v2  ;;  %v49_v44 = vmul.f32 0.5, %v47_v1  ;;  %v50_v47 = vmul.f32 0.5, %v48_v2  ;;  %v131_v2 = vld [vmem:[#allocation6] sm:$0xf] }
  0x1f   :  { %v53_v5 = vand.u32 2147483647, %v51_v3  ;;  %vm93_vm0 = vcmp.lt.f32.partialorder %v51_v3, 0.0  ;;  %253 = vmatpush3.msk.msra.mxu0 %vm122_vm2, %v131_v2  ;;  %vm343_vm3 = vmmov 0   ;;  %v141_v3 = vlaneseq  ;;  %s344_s24 = smov [#allocation8]  }
  0x20   :  { %v54_v6 = vand.u32 2147483647, %v52_v4  ;;  %vm94_vm1 = vcmp.lt.f32.partialorder %v52_v4, 0.0  ;;  %254 = vmatprep.mubr.msk.f32.mxu0 %vm343_vm3, %v342_v0  ;;  %vm151_vm4 = vcmask 1041409   ;;  %vm153_vm5 = vcmask 31744   ;;  %s237_s25 = sshll.u32 %s344_s24, 4  ;;  %s238_s25 = int_to_ptr.vmem [resolvable:$true] %s237_s25 }
  0x21   :  { %v55_v7 = vmul.f32 0.3275911, %v53_v5  ;;  %v81_v11 = vmul.f32 %v53_v5, %v53_v5  ;;  %v142_v4 = vand.u32 127, %v141_v3  ;;  %v144_v5 = vshrl.u32 %v141_v3, 7  ;;  %s312_s26 = scalar_lea.vmem %s238_s25, 32  ;;  %p317_p11 = scmp.lt.s32.totalorder %s238_s25, %s238_s25 }
  0x22   :  { %v56_v8 = vmul.f32 0.3275911, %v54_v6  ;;  %v82_v12 = vmul.f32 %v54_v6, %v54_v6  ;;  %vm229_vm6 = vcmask 58368   ;;  %p313_p10 = scmp.ne.s32.totalorder %s238_s25, %s312_s26  ;;  %p318_p12 = scmp.lt.s32.totalorder %s312_s26, %s312_s26 }
  0x23   :  { %v57_v9 = vadd.f32 1.0, %v55_v7  ;;  %v83_v13 = vsub.f32 0.0, %v81_v11  ;;  %v145_v7 = vsub.s32 %v142_v4, %v144_v5 }
  0x24   :  { %v58_v10 = vadd.f32 1.0, %v56_v8  ;;  %v84_v14 = vsub.f32 0.0, %v82_v12  ;;  %v111_v54 = vld [vmem:[#allocation2] sm:$0xf]  ;;  %v112_v57 = vld [vmem:[#allocation2 + $0x4] sm:$0xf]  ;;  %p319_p13 = por %p318_p12, %p317_p11 }
  0x25   :  { %264 = vrcp.f32 %v57_v9  ;;  %v85_v15 = vmul.f32 1.442695, %v83_v13 }
  0x26   :  { %266 = vrcp.f32 %v58_v10  ;;  %v87_v17 = vmul.f32 1.442695, %v84_v14  ;;  %v247_v14 = vld [vmem:[%s383_s2] ss:$0 sm:$0xff]  ;;  %p320_p0 = pnand %p319_p13, %p313_p10 }
  0x27   :  { %268 = vpow2.f32 %v85_v15 }
  0x28   :  { %270 = vpow2.f32 %v87_v17 }
  0x32   :  { %v265_v16 = vpop.eup %264 }
  0x33   :  { %v267_v18 = vpop.eup %266  ;;  %v63_v19 = vmul.f32 1.0614054, %v265_v16 }
  0x34   :  { %v64_v20 = vmul.f32 1.0614054, %v267_v18  ;;  %v269_v34 = vpop.eup %268 }
  0x35   :  { %v65_v21 = vadd.f32 -1.4531521, %v63_v19  ;;  %v271_v36 = vpop.eup %270 }
  0x36   :  { %v66_v22 = vadd.f32 -1.4531521, %v64_v20 }
  0x37   :  { %v67_v23 = vmul.f32 %v265_v16, %v65_v21 }
  0x38   :  { %v68_v24 = vmul.f32 %v267_v18, %v66_v22 }
  0x39   :  { %v69_v25 = vadd.f32 1.4214138, %v67_v23 }
  0x3a   :  { %v70_v26 = vadd.f32 1.4214138, %v68_v24 }
  0x3b   :  { %v71_v27 = vmul.f32 %v265_v16, %v69_v25 }
  0x3c   :  { %v72_v28 = vmul.f32 %v267_v18, %v70_v26 }
  0x3d   :  { %v73_v29 = vadd.f32 -0.28449672, %v71_v27 }
  0x3e   :  { %v74_v30 = vadd.f32 -0.28449672, %v72_v28 }
  0x3f   :  { %v75_v31 = vmul.f32 %v265_v16, %v73_v29 }
  0x40   :  { %v76_v32 = vmul.f32 %v267_v18, %v74_v30 }
  0x41   :  { %v77_v33 = vadd.f32 0.2548296, %v75_v31 }
  0x42   :  { %v78_v35 = vadd.f32 0.2548296, %v76_v32 }
  0x43   :  { %v79_v37 = vmul.f32 %v265_v16, %v77_v33 }
  0x44   :  { %v80_v38 = vmul.f32 %v267_v18, %v78_v35 }
  0x45   :  { %v89_v39 = vmul.f32 %v269_v34, %v79_v37 }
  0x46   :  { %v90_v40 = vmul.f32 %v271_v36, %v80_v38 }
  0x47   :  { %v91_v41 = vsub.f32 1.0, %v89_v39 }
  0x48   :  { %v92_v42 = vsub.f32 1.0, %v90_v40 }
  0x49   :  { %v95_v43 = vsub.f32 0.0, %v91_v41 }
  0x4a   :  { %v96_v45 = vsub.f32 0.0, %v92_v42 }
  0x4b   :  { %v97_v46 = vsel %vm93_vm0, %v95_v43, %v91_v41 }
  0x4c   :  { %v99_v48 = vadd.f32 1.0, %v97_v46  ;;  %v98_v49 = vsel %vm94_vm1, %v96_v45, %v92_v42 }
  0x4d   :  { %v100_v50 = vadd.f32 1.0, %v98_v49 }
  0x4e   :  { %v101_v51 = vmul.f32 %v99_v48, %v49_v44 }
  0x4f   :  { %v102_v52 = vmul.f32 %v100_v50, %v50_v47 }
  0x50   :  { %v105_v53 = vrot.slane %v101_v51, 4 }
  0x51   :  { %v106_v55 = vrot.slane %v102_v52, 4 }
  0x52   :  { %v109_v56 = vadd.f32 %v105_v53, %v101_v51 }
  0x53   :  { %v110_v58 = vadd.f32 %v106_v55, %v102_v52 }
  0x54   :  { %v113_v59 = vadd.f32 %v111_v54, %v109_v56 }
  0x55   :  { %v114_v60 = vadd.f32 %v112_v57, %v110_v58 }
  0x56   :  { %115 = vst [vmem:[#allocation2] sm:$0xf] %v113_v59 }
  0x57   :  { %116 = vst [vmem:[#allocation2 + $0x4] sm:$0xf] %v114_v60 }
  0x5d   :  { %v120_v61 = vld [vmem:[#allocation2] sm:$0xf] }
  0x5e   :  { %v123_v62 = vsel %vm122_vm2, %v120_v61, 0.0  ;;  %v121_v63 = vld [vmem:[#allocation2 + $0x4] sm:$0xf] }
  0x5f   :  { %124 = vadd.xlane.f32.xlu0 %v123_v62  ;;  %v126_v1 = vsel %vm122_vm2, %v121_v63, 0.0 }
  0x63   :  { %127 = vadd.xlane.f32.xlu0 %v126_v1 }
  0xe8   :  { %v125_v6 = vpop.xlane.xlu0 %124 }
  0xe9   :  { %v129_v8 = vmul.f32 0.00390625, %v125_v6 }
  0xeb   :  { %v146_v11 = vrot.slane %v129_v8, %v145_v7 }
  0xec   :  { %v128_v9 = vpop.xlane.xlu0 %127 }
  0xed   :  { %v130_v10 = vmul.f32 0.00390625, %v128_v9 }
  0xef   :  { %v150_v12 = vrot.slane %v130_v10, %v145_v7 }
  0xf1   :  { %v152_v13 = vsel %vm151_vm4, %v150_v12, %v146_v11 }
  0xf2   :  { %255 = vmatmul.mubr.msk.f32.vlgmr.msra.gmra.mxu0 %vm153_vm5, %v152_v13 }
 0x1b2   :  { %v225_v0 = vpop.f32.mrf.mxu0 }
 0x1b3   :  { %v226_v15 = vadd.f32 %v247_v14, %v225_v0 }
 0x1b4   :  { %v256_v16 = vpop.f32.mrf.mxu0 }
 0x1b5   :  { %230 = vst.msk [vmem:[#allocation8] sm:$0x3] %vm229_vm6, %v226_v15 }
 0x1b6   :  { %323 = shalt.err (!%p320_p0)
}
 0x1b7   :  { %240 = dma.vmem_to_hbm [thread:$0]  %s238_s25, 32, %s384_s3, [#allocation5]  }
 0x1b8   :  { %336 = dma.done.wait [#allocation5], 32  }
 0x1b9   :  { %337 = vsyncadd [#allocation5], 4294967264 }
 0x1ba   :  { %244 = vsyncpa [#allocation4], 1 }
 0x1bb   :  { %245 = vsyncpa [#allocation7], 1 }
 0x1bc   :  { %246 = vsyncpa [#allocation5], 1 }

</bundles_post_ra>
